<compile_context>
chip_gen: v5e
topology: v5e:2x2
jax: 0.10.0
libtpu: 0.0.40
codegen_flags: <defaults>
</compile_context>

<pallas_src>
import functools

import jax
import jax.numpy as jnp
from jax.experimental import pallas as pl
from jax.experimental.pallas import tpu as pltpu


def _rmsnorm_kernel(x_ref, w_ref, o_ref, *, eps, inv_dim):
    # Full-width path (dim is the whole lane extent of the block).
    x = x_ref[...].astype(jnp.float32)
    sum_sq = jnp.sum(x * x, axis=-1, keepdims=True)
    normed = x * jax.lax.rsqrt(sum_sq * inv_dim + eps)
    # Match torch: ._norm(x.float()).type_as(x), then multiply by weight
    # (which promotes to the result dtype).
    y = normed.astype(x_ref.dtype) * w_ref[...]          # w_ref is (1, D)
    o_ref[...] = y.astype(o_ref.dtype)


def _rmsnorm_folded_kernel(x_ref, w_ref, m_ref, o_ref, *, eps, inv_dim):
    # Lane-folded path: each array row holds g = 128 // dim logical rows, so
    # x_ref is (tile, g*dim) and stays lane-dense.  m_ref is a (g*dim, g*dim)
    # block-diagonal 0/1 matrix; (x*x) @ m gives every lane the sum of squares
    # of its own group, computed on the otherwise-idle MXU.
    x = x_ref[...].astype(jnp.float32)
    sum_sq = jnp.dot(x * x, m_ref[...],
                     preferred_element_type=jnp.float32,
                     precision=jax.lax.Precision.HIGHEST)
    normed = x * jax.lax.rsqrt(sum_sq * inv_dim + eps)
    y = normed.astype(x_ref.dtype) * w_ref[...]          # w_ref is (1, g*dim)
    o_ref[...] = y.astype(o_ref.dtype)


def rmsnorm(x, weight, eps=1e-6):
    """RMSNorm over the last dimension of x.  x: (..., dim), weight: (dim,)."""
    dim = x.shape[-1]
    assert weight.shape == (dim,)
    lead_shape = x.shape[:-1]
    rows = 1
    for s in lead_shape:
        rows *= s

    out_dtype = jnp.result_type(x.dtype, weight.dtype)
    in_bytes = jnp.dtype(x.dtype).itemsize
    out_bytes = jnp.dtype(out_dtype).itemsize
    w_bytes = jnp.dtype(weight.dtype).itemsize

    # --- lane folding for small dim (lane-dense loads/stores) -------------
    g = 1
    if dim < 128 and 128 % dim == 0:
        g_cand = 128 // dim
        if rows % g_cand == 0 and rows >= g_cand:
            g = g_cand
    # TODO(synk): dim < 128 that does not divide 128 (or a row count not
    # divisible by the fold factor) still takes the masked-partial-store path.

    R = rows // g          # array rows actually handed to the kernel
    D = g * dim            # lane width of each array row
    x2d = x.reshape(R, D)
    w_full = weight if g == 1 else jnp.tile(weight, g)
    w2d = w_full.reshape(1, D)

    # --- generation-aware VMEM / tile sizing -------------------------------
    vmem_cap = 64 * 1024 * 1024                     # conservative default (v7x)
    try:
        vmem_cap = int(pltpu.get_tpu_info().vmem_capacity_bytes)
    except Exception:
        pass
    vmem_limit = int(vmem_cap * 0.75)               # ~96 MiB v5e/v6e, ~48 MiB v7x

    sublane = max(8, 32 // min(in_bytes, out_bytes))

    # Per-array-row VMEM bytes: double-buffered input tile, double-buffered
    # output tile, plus ~2 f32 temporaries (x upcast + normed) in the body.
    bytes_per_row = D * (2 * in_bytes + 2 * out_bytes + 2 * 4)
    tile_budget = int(vmem_limit * 0.6) - 2 * D * w_bytes
    max_tile = max(sublane, tile_budget // bytes_per_row)

    # Cap the per-step input DMA block by bytes (few-MiB blocks hit ~85% of
    # HBM roofline); allow bigger blocks on the 128-MiB-VMEM generations.
    target_block_bytes = (8 if vmem_cap > 96 * 1024 * 1024 else 4) * 1024 * 1024
    byte_cap = max(sublane, target_block_bytes // (D * in_bytes))
    tile = min(max_tile, byte_cap)

    # Guarantee >= 2 grid steps when rows allow: v7x shards the "parallel"
    # grid axis across its 2 TensorCores; one extra step is negligible elsewhere.
    R_rounded = ((R + sublane - 1) // sublane) * sublane
    if R_rounded >= 2 * sublane:
        half = ((R_rounded // 2 + sublane - 1) // sublane) * sublane
        tile = min(tile, half)

    tile = max(sublane, (tile // sublane) * sublane)   # sublane-aligned
    tile = min(tile, R_rounded)

    grid = (pl.cdiv(R, tile),)

    # --- kernel / specs -----------------------------------------------------
    operands = [x2d, w2d]
    in_specs = [
        pl.BlockSpec((tile, D), lambda i: (i, 0)),
        pl.BlockSpec((1, D), lambda i: (0, 0)),        # resident weight tile
    ]
    if g > 1:
        ids = jnp.arange(D, dtype=jnp.int32) // dim
        mmat = (ids[:, None] == ids[None, :]).astype(jnp.float32)  # (D, D)
        operands.append(mmat)
        in_specs.append(pl.BlockSpec((D, D), lambda i: (0, 0)))    # resident mask
        kernel = functools.partial(_rmsnorm_folded_kernel,
                                   eps=float(eps), inv_dim=1.0 / dim)
    else:
        kernel = functools.partial(_rmsnorm_kernel,
                                   eps=float(eps), inv_dim=1.0 / dim)

    cost = pl.CostEstimate(
        flops=3 * rows * dim + (2 * D * D * R if g > 1 else 0),
        transcendentals=rows,
        bytes_accessed=rows * dim * (in_bytes + out_bytes) + dim * w_bytes,
    )

    out = pl.pallas_call(
        kernel,
        out_shape=jax.ShapeDtypeStruct((R, D), out_dtype),
        grid_spec=pltpu.PrefetchScalarGridSpec(
            num_scalar_prefetch=0,
            grid=grid,
            in_specs=in_specs,
            out_specs=pl.BlockSpec((tile, D), lambda i: (i, 0)),
        ),
        compiler_params=pltpu.CompilerParams(
            dimension_semantics=("parallel",),
            vmem_limit_bytes=vmem_limit,
        ),
        cost_estimate=cost,
    )(*operands)

    return out.reshape(*lead_shape, dim)


if __name__ == "__main__":
    key = jax.random.PRNGKey(0)
    batch, seq, hidden = 2, 8, 32
    x = jax.random.normal(key, (batch, seq, hidden), dtype=jnp.float32)
    # Deterministic parameter init, matching nn.Parameter(torch.ones(dim)).
    weight = jnp.ones((hidden,), dtype=jnp.float32)
    eps = 1e-6

    y = rmsnorm(x, weight, eps)
    y = jax.block_until_ready(y)

    # Correctness check against plain-JAX reference (torch semantics).
    xf = x.astype(jnp.float32)
    ref = xf * jax.lax.rsqrt(jnp.mean(xf * xf, axis=-1, keepdims=True) + eps)
    ref = ref.astype(x.dtype) * weight
    assert jnp.allclose(y, ref, atol=1e-5, rtol=1e-5), "mismatch vs reference"

    print("KERNEL_OK")
</pallas_src>

<mosaic_0001>
module attributes {stable_mosaic.version = 11 : i64} {
  func.func @_rmsnorm_folded_kernel(%arg0: i32, %arg1: memref<8x128xf32, #tpu.memory_space<vmem>>, %arg2: memref<1x128xf32, #tpu.memory_space<vmem>>, %arg3: memref<128x128xf32, #tpu.memory_space<vmem>>, %arg4: memref<8x128xf32, #tpu.memory_space<vmem>>) attributes {dimension_semantics = [#tpu.dimension_semantics<parallel>], iteration_bounds = array<i64: 1>, scalar_prefetch = 0 : i64, scratch_operands = 0 : i64, tpu.core_type = #tpu.core_type<tc>, window_params = [{transform_indices = @transform_0, window_bounds = array<i64: 8, 128>}, {pipeline_mode = #tpu.pipeline_mode<synchronous>, transform_indices = @transform_1, window_bounds = array<i64: 1, 128>}, {pipeline_mode = #tpu.pipeline_mode<synchronous>, transform_indices = @transform_2, window_bounds = array<i64: 128, 128>}, {transform_indices = @transform_3, window_bounds = array<i64: 8, 128>}]} {
    %c0 = arith.constant 0 : index
    %c0_0 = arith.constant 0 : index
    %0 = vector.load %arg1[%c0, %c0_0] : memref<8x128xf32, #tpu.memory_space<vmem>>, vector<8x128xf32>
    %1 = arith.mulf %0, %0 : vector<8x128xf32>
    %c0_1 = arith.constant 0 : index
    %c0_2 = arith.constant 0 : index
    %2 = vector.load %arg3[%c0_1, %c0_2] : memref<128x128xf32, #tpu.memory_space<vmem>>, vector<128x128xf32>
    %cst = arith.constant dense<0.000000e+00> : vector<8x128xf32>
    %3 = tpu.matmul %1, %2, %cst {dimension_numbers = #tpu.dot_dimension_numbers<[1], [0], [0], [1], [0, 0, 1, 1], [], []>, precision = #tpu.contract_precision<fp32>} : vector<8x128xf32>, vector<128x128xf32>, vector<8x128xf32> -> vector<8x128xf32>
    %cst_3 = arith.constant 3.125000e-02 : f32
    %4 = vector.broadcast %cst_3 : f32 to vector<8x128xf32>
    %5 = arith.mulf %3, %4 : vector<8x128xf32>
    %cst_4 = arith.constant 9.99999997E-7 : f32
    %6 = vector.broadcast %cst_4 : f32 to vector<8x128xf32>
    %7 = arith.addf %5, %6 : vector<8x128xf32>
    %8 = math.rsqrt %7 : vector<8x128xf32>
    %9 = arith.mulf %0, %8 : vector<8x128xf32>
    %c0_5 = arith.constant 0 : index
    %c0_6 = arith.constant 0 : index
    %10 = vector.load %arg2[%c0_5, %c0_6] : memref<1x128xf32, #tpu.memory_space<vmem>>, vector<1x128xf32>
    %11 = vector.broadcast %10 : vector<1x128xf32> to vector<8x128xf32>
    %12 = arith.mulf %9, %11 : vector<8x128xf32>
    %c0_7 = arith.constant 0 : index
    %c0_8 = arith.constant 0 : index
    %13 = vector.load %arg4[%c0_7, %c0_8] : memref<8x128xf32, #tpu.memory_space<vmem>>, vector<8x128xf32>
    tpu.vector_store %arg4[%c0_7, %c0_8], %12 {strides = array<i32>} : memref<8x128xf32, #tpu.memory_space<vmem>>, vector<8x128xf32>,
    return
  }
  func.func @transform_0(%arg0: i32) -> (i32, i32) {
    %c0_i32 = arith.constant 0 : i32
    %c0_i32_0 = arith.constant 0 : i32
    return %arg0, %c0_i32 : i32, i32
  }
  func.func @transform_1(%arg0: i32) -> (i32, i32) {
    %c0_i32 = arith.constant 0 : i32
    %c0_i32_0 = arith.constant 0 : i32
    %c0_i32_1 = arith.constant 0 : i32
    return %c0_i32, %c0_i32_0 : i32, i32
  }
  func.func @transform_2(%arg0: i32) -> (i32, i32) {
    %c0_i32 = arith.constant 0 : i32
    %c0_i32_0 = arith.constant 0 : i32
    %c0_i32_1 = arith.constant 0 : i32
    return %c0_i32, %c0_i32_0 : i32, i32
  }
  func.func @transform_3(%arg0: i32) -> (i32, i32) {
    %c0_i32 = arith.constant 0 : i32
    %c0_i32_0 = arith.constant 0 : i32
    return %arg0, %c0_i32 : i32, i32
  }
}

</mosaic_0001>

<bundles_post_ra>
// kernel: tpu_custom_call.1
= control target key start
LH: loop header
LB: loop body
LE: loop exit
PB: predicated region body
PF: predicated region fallthrough
CT: control target
= control target key end

     0   :  { %8 = vsyncpa [#allocation3], 0  ;;  %s860_s0 = inlined_call_operand.hbm [shape: f32[4,128], index: 0, kind: input, shape index: {}]   ;;  %s861_s1 = inlined_call_operand.hbm [shape: f32[1,128], index: 1, kind: input, shape index: {}]   ;;  %s862_s2 = inlined_call_operand.hbm [shape: f32[128,128], index: 2, kind: input, shape index: {}]   ;;  %s863_s3 = inlined_call_operand.hbm [shape: f32[4,128], index: 3, kind: output, shape index: {}]  }
   0x1   :  { %9 = vsyncpa [#allocation6], 0 }
   0x2   :  { %10 = vsyncpa [#allocation4], 0  ;;  %s29_s14 = sshll.u32 %s861_s1, 4  ;;  %s30_s14 = int_to_ptr.hbm [resolvable:$true] %s29_s14 }
   0x3   :  { %14 = vsyncadd [#allocation3], 64  ;;  %s571_s15 = smov [#allocation5]   ;;  %s15_s19 = sshll.u32 %s860_s0, 4  ;;  %s16_s19 = int_to_ptr.hbm [resolvable:$true] %s15_s19 }
   0x4   :  { %s31_s16 = sshll.u32 %s571_s15, 4  ;;  %s572_s20 = smov [#allocation2]   ;;  %s32_s16 = int_to_ptr.vmem [resolvable:$true] %s31_s16 }
   0x5   :  { %34 = dma.hbm_to_vmem [thread:$0]  %s30_s14, 16, %s32_s16, [#allocation6]  }
   0x6   :  { %s17_s21 = sshll.u32 %s572_s20, 4  ;;  %s573_s22 = smov 64   ;;  %s18_s21 = int_to_ptr.vmem [resolvable:$true] %s17_s21 }
   0x7   :  { %s574_s23 = smov 4   ;;  %s39_s25 = sshll.u32 %s862_s2, 4  ;;  %s40_s25 = int_to_ptr.hbm [resolvable:$true] %s39_s25 }
   0x8   :  { %23 = dma.hbm_to_vmem [thread:$0]  %s16_s19, 64, %s18_s21, [#allocation3], %s573_s22, %s573_s22, %s574_s23  }
   0x9   :  { %s575_s26 = smov [#allocation7]   ;;  %s576_s0 = smov 128  }
   0xa   :  { %s41_s27 = sshll.u32 %s575_s26, 4  ;;  %s577_s28 = smov 8   ;;  %s42_s27 = int_to_ptr.vmem [resolvable:$true] %s41_s27 }
   0xb   :  { %47 = dma.hbm_to_vmem [thread:$0]  %s40_s25, 2048, %s42_s27, [#allocation6], %s576_s0, %s576_s0, %s577_s28  }
   0xc   :  { %565 = dma.done.wait [#allocation3], 128  }
   0xd   :  { %566 = vsyncadd [#allocation3], 4294967168 }
   0xe   :  { %567 = dma.done.wait [#allocation6], 2064  }
   0xf   :  { %568 = vsyncadd [#allocation6], 4294965232  ;;  %v77_v0 = vld [vmem:[#allocation7 + $0x78] sm:$0xff]  ;;  %v76_v1 = vld [vmem:[#allocation7 + $0x70] sm:$0xff] }
  0x10   :  { %v75_v2 = vld [vmem:[#allocation7 + $0x68] sm:$0xff]  ;;  %v611_v3 = vand.u32 4294901760, %v77_v0  ;;  %v613_v4 = vand.u32 4294901760, %v76_v1  ;;  %v74_v6 = vld [vmem:[#allocation7 + $0x60] sm:$0xff]  ;;  %v73_v7 = vld [vmem:[#allocation7 + $0x58] sm:$0xff] }
  0x11   :  { %v615_v5 = vand.u32 4294901760, %v75_v2  ;;  %v72_v8 = vld [vmem:[#allocation7 + $0x50] sm:$0xff]  ;;  %v617_v9 = vand.u32 4294901760, %v74_v6  ;;  %v619_v10 = vand.u32 4294901760, %v73_v7  ;;  %v71_v12 = vld [vmem:[#allocation7 + $0x48] sm:$0xff]  ;;  %v70_v13 = vld [vmem:[#allocation7 + $0x40] sm:$0xff] }
  0x12   :  { %v621_v11 = vand.u32 4294901760, %v72_v8  ;;  %79 = vmatpush.msra.mxu0 %v611_v3  ;;  %v625_v14 = vsub.f32 %v77_v0, %v611_v3  ;;  %v628_v15 = vsub.f32 %v76_v1, %v613_v4  ;;  %v633_v17 = vand.u32 4294901760, %v71_v12  ;;  %v69_v18 = vld [vmem:[#allocation7 + $0x38] sm:$0xff]  ;;  %275 = vmatpush.msra.mxu3 %v611_v3  ;;  %v68_v26 = vld [vmem:[#allocation7 + $0x30] sm:$0xff]  ;;  %v67_v36 = vld [vmem:[#allocation7 + $0x28] sm:$0xff] }
  0x13   :  { %v631_v16 = vsub.f32 %v75_v2, %v615_v5  ;;  %v637_v19 = vsub.f32 %v74_v6, %v617_v9  ;;  %v640_v20 = vsub.f32 %v73_v7, %v619_v10  ;;  %v649_v25 = vand.u32 4294901760, %v70_v13  ;;  %v66_v42 = vld [vmem:[#allocation7 + $0x20] sm:$0xff]  ;;  %v65_v47 = vld [vmem:[#allocation7 + $0x18] sm:$0xff]  ;;  %v64_v55 = vld [vmem:[#allocation7 + $0x10] sm:$0xff] }
  0x14   :  { %v643_v21 = vsub.f32 %v72_v8, %v621_v11  ;;  %81 = vmatpush.msra.mxu0 %v613_v4  ;;  %v121_v22 = vand.u32 4294901760, %v625_v14  ;;  %v127_v23 = vand.u32 4294901760, %v628_v15  ;;  %222 = vmatpush.msra.mxu2 %v625_v14  ;;  %v653_v28 = vand.u32 4294901760, %v69_v18  ;;  %v63_v60 = vld [vmem:[#allocation7 + $0x8] sm:$0xff]  ;;  %v723_v61 = vld [vmem:[#allocation2] sm:$0xff]  ;;  %v62_v2 = vld [vmem:[#allocation7] sm:$0xff] }
  0x15   :  { %v133_v24 = vand.u32 4294901760, %v631_v16  ;;  %v139_v27 = vand.u32 4294901760, %v637_v19  ;;  %v656_v29 = vsub.f32 %v71_v12, %v633_v17  ;;  %277 = vmatpush.msra.mxu3 %v613_v4  ;;  %v145_v33 = vand.u32 4294901760, %v640_v20 }
  0x16   :  { %83 = vmatpush.msra.mxu0 %v615_v5  ;;  %v122_v30 = vsub.f32 %v625_v14, %v121_v22  ;;  %v128_v31 = vsub.f32 %v628_v15, %v127_v23  ;;  %225 = vmatpush.msra.mxu2 %v628_v15  ;;  %v151_v34 = vand.u32 4294901760, %v643_v21  ;;  %v672_v35 = vand.u32 4294901760, %v68_v26 }
  0x17   :  { %v134_v32 = vsub.f32 %v631_v16, %v133_v24  ;;  %279 = vmatpush.msra.mxu3 %v615_v5  ;;  %v140_v39 = vsub.f32 %v637_v19, %v139_v27  ;;  %v680_v40 = vsub.f32 %v70_v13, %v649_v25  ;;  %v157_v41 = vand.u32 4294901760, %v656_v29 }
  0x18   :  { %v123_v37 = vand.u32 4294901760, %v122_v30  ;;  %85 = vmatpush.msra.mxu0 %v617_v9  ;;  %v129_v38 = vand.u32 4294901760, %v128_v31  ;;  %228 = vmatpush.msra.mxu2 %v631_v16  ;;  %v146_v44 = vsub.f32 %v640_v20, %v145_v33  ;;  %v689_v45 = vand.u32 4294901760, %v67_v36 }
  0x19   :  { %281 = vmatpush.msra.mxu3 %v617_v9  ;;  %v135_v43 = vand.u32 4294901760, %v134_v32  ;;  %v692_v46 = vsub.f32 %v69_v18, %v653_v28  ;;  %v163_v48 = vand.u32 4294901760, %v680_v40  ;;  %v141_v49 = vand.u32 4294901760, %v140_v39 }
  0x1a   :  { %124 = vmatpush.msra.mxu1 %v123_v37  ;;  %87 = vmatpush.msra.mxu0 %v619_v10  ;;  %v152_v50 = vsub.f32 %v643_v21, %v151_v34  ;;  %v701_v51 = vand.u32 4294901760, %v66_v42  ;;  %v704_v52 = vsub.f32 %v68_v26, %v672_v35  ;;  %v158_v53 = vsub.f32 %v656_v29, %v157_v41 }
  0x1b   :  { %231 = vmatpush.msra.mxu2 %v637_v19  ;;  %283 = vmatpush.msra.mxu3 %v619_v10  ;;  %v709_v54 = vand.u32 4294901760, %v65_v47  ;;  %v147_v56 = vand.u32 4294901760, %v146_v44  ;;  %v169_v57 = vand.u32 4294901760, %v692_v46  ;;  %v716_v58 = vsub.f32 %v67_v36, %v689_v45 }
  0x1c   :  { %130 = vmatpush.msra.mxu1 %v129_v38  ;;  %89 = vmatpush.msra.mxu0 %v621_v11  ;;  %v164_v59 = vsub.f32 %v680_v40, %v163_v48  ;;  %v153_v62 = vand.u32 4294901760, %v152_v50  ;;  %v175_v63 = vand.u32 4294901760, %v704_v52  ;;  %v727_v0 = vand.u32 4294901760, %v64_v55 }
  0x1d   :  { %234 = vmatpush.msra.mxu2 %v640_v20  ;;  %285 = vmatpush.msra.mxu3 %v621_v11  ;;  %v730_v1 = vsub.f32 %v66_v42, %v701_v51  ;;  %v159_v6 = vand.u32 4294901760, %v158_v53  ;;  %v733_v7 = vsub.f32 %v65_v47, %v709_v54  ;;  %v170_v8 = vsub.f32 %v692_v46, %v169_v57 }
  0x1e   :  { %136 = vmatpush.msra.mxu1 %v135_v43  ;;  %91 = vmatpush.msra.mxu0 %v633_v17  ;;  %v181_v12 = vand.u32 4294901760, %v716_v58  ;;  %v742_v13 = vand.u32 4294901760, %v63_v60  ;;  %v61_v18 = vmul.f32 %v723_v61, %v723_v61  ;;  %v165_v26 = vand.u32 4294901760, %v164_v59 }
  0x1f   :  { %237 = vmatpush.msra.mxu2 %v643_v21  ;;  %287 = vmatpush.msra.mxu3 %v633_v17  ;;  %v746_v30 = vand.u32 4294901760, %v62_v2  ;;  %v176_v31 = vsub.f32 %v704_v52, %v175_v63  ;;  %v187_v32 = vand.u32 4294901760, %v730_v1  ;;  %v756_v36 = vsub.f32 %v64_v55, %v727_v0 }
  0x20   :  { %142 = vmatpush.msra.mxu1 %v141_v49  ;;  %93 = vmatpush.msra.mxu0 %v649_v25  ;;  %v758_v37 = vand.u32 4294901760, %v61_v18  ;;  %v193_v38 = vand.u32 4294901760, %v733_v7  ;;  %v171_v39 = vand.u32 4294901760, %v170_v8  ;;  %v182_v42 = vsub.f32 %v716_v58, %v181_v12 }
  0x21   :  { %240 = vmatpush.msra.mxu2 %v656_v29  ;;  %289 = vmatpush.msra.mxu3 %v649_v25  ;;  %v768_v43 = vsub.f32 %v63_v60, %v742_v13  ;;  %v177_v47 = vand.u32 4294901760, %v176_v31  ;;  %v188_v49 = vsub.f32 %v730_v1, %v187_v32  ;;  %v199_v50 = vand.u32 4294901760, %v756_v36  ;;  %v466_v29 = vld [vmem:[#allocation5] ss:$0 sm:$0xff] }
  0x22   :  { %148 = vmatpush.msra.mxu1 %v147_v56  ;;  %95 = vmatpush.msra.mxu0 %v653_v28  ;;  %v111_v44 = vsub.f32 %v61_v18, %v758_v37  ;;  %v779_v53 = vsub.f32 %v62_v2, %v746_v30  ;;  %v183_v55 = vand.u32 4294901760, %v182_v42  ;;  %v194_v56 = vsub.f32 %v733_v7, %v193_v38 }
  0x23   :  { %243 = vmatpush.msra.mxu2 %v680_v40  ;;  %291 = vmatpush.msra.mxu3 %v653_v28  ;;  %v205_v59 = vand.u32 4294901760, %v768_v43  ;;  %v200_v2 = vsub.f32 %v756_v36, %v199_v50 }
  0x24   :  { %154 = vmatpush.msra.mxu1 %v153_v62  ;;  %97 = vmatpush.msra.mxu0 %v672_v35  ;;  %v112_v60 = vand.u32 4294901760, %v111_v44  ;;  %v189_v62 = vand.u32 4294901760, %v188_v49  ;;  %v195_v8 = vand.u32 4294901760, %v194_v56 }
  0x25   :  { %246 = vmatpush.msra.mxu2 %v692_v46  ;;  %293 = vmatpush.msra.mxu3 %v672_v35  ;;  %v206_v18 = vsub.f32 %v768_v43, %v205_v59  ;;  %v201_v31 = vand.u32 4294901760, %v200_v2 }
  0x26   :  { %160 = vmatpush.msra.mxu1 %v159_v6  ;;  %99 = vmatpush.msra.mxu0 %v689_v45  ;;  %v211_v6 = vand.u32 4294901760, %v779_v53 }
  0x27   :  { %249 = vmatpush.msra.mxu2 %v704_v52  ;;  %295 = vmatpush.msra.mxu3 %v689_v45  ;;  %v207_v42 = vand.u32 4294901760, %v206_v18 }
  0x28   :  { %166 = vmatpush.msra.mxu1 %v165_v26  ;;  %101 = vmatpush.msra.mxu0 %v701_v51  ;;  %v113_v26 = vsub.f32 %v111_v44, %v112_v60 }
  0x29   :  { %252 = vmatpush.msra.mxu2 %v716_v58  ;;  %297 = vmatpush.msra.mxu3 %v701_v51 }
  0x2a   :  { %172 = vmatpush.msra.mxu1 %v171_v39  ;;  %103 = vmatpush.msra.mxu0 %v709_v54  ;;  %v212_v39 = vsub.f32 %v779_v53, %v211_v6 }
  0x2b   :  { %255 = vmatpush.msra.mxu2 %v730_v1  ;;  %299 = vmatpush.msra.mxu3 %v709_v54 }
  0x2c   :  { %178 = vmatpush.msra.mxu1 %v177_v47  ;;  %105 = vmatpush.msra.mxu0 %v727_v0  ;;  %v114_v47 = vand.u32 4294901760, %v113_v26  ;;  %v213_v49 = vand.u32 4294901760, %v212_v39 }
  0x2d   :  { %258 = vmatpush.msra.mxu2 %v733_v7  ;;  %301 = vmatpush.msra.mxu3 %v727_v0 }
  0x2e   :  { %184 = vmatpush.msra.mxu1 %v183_v55  ;;  %107 = vmatpush.msra.mxu0 %v742_v13 }
  0x2f   :  { %261 = vmatpush.msra.mxu2 %v756_v36  ;;  %303 = vmatpush.msra.mxu3 %v742_v13 }
  0x30   :  { %190 = vmatpush.msra.mxu1 %v189_v62  ;;  %109 = vmatpush.msra.mxu0 %v746_v30 }
  0x31   :  { %264 = vmatpush.msra.mxu2 %v768_v43  ;;  %305 = vmatpush.msra.mxu3 %v746_v30 }
  0x32   :  { %316 = vmatpush.msrb.mxu0 %v121_v22  ;;  %196 = vmatpush.msra.mxu1 %v195_v8 }
  0x33   :  { %267 = vmatpush.msra.mxu2 %v779_v53  ;;  %309 = vmatmul.f32.vlgmr.msra.gmra.mxu3 %v112_v60 }
  0x34   :  { %320 = vmatpush.msrb.mxu0 %v127_v23  ;;  %202 = vmatpush.msra.mxu1 %v201_v31 }
  0x35   :  { %270 = vmatmul.f32.vlgmr.msra.gmra.mxu2 %v111_v44  ;;  %115 = vmatmul.f32.vlgmr.msra.gmra.mxu0 %v114_v47 }
  0x36   :  { %324 = vmatpush.msrb.mxu0 %v133_v24  ;;  %208 = vmatpush.msra.mxu1 %v207_v42 }
  0x38   :  { %328 = vmatpush.msrb.mxu0 %v139_v27  ;;  %214 = vmatpush.msra.mxu1 %v213_v49 }
  0x39   :  { %216 = vmatmul.f32.vlgmr.msra.gmra.mxu1 %v758_v37 }
  0x3a   :  { %383 = vmatpush.msrb.mxu1 %v611_v3  ;;  %332 = vmatpush.msrb.mxu0 %v145_v33 }
  0x3c   :  { %385 = vmatpush.msrb.mxu1 %v613_v4  ;;  %336 = vmatpush.msrb.mxu0 %v151_v34 }
  0x3e   :  { %387 = vmatpush.msrb.mxu1 %v615_v5  ;;  %340 = vmatpush.msrb.mxu0 %v157_v41 }
  0x40   :  { %389 = vmatpush.msrb.mxu1 %v617_v9  ;;  %344 = vmatpush.msrb.mxu0 %v163_v48 }
  0x42   :  { %391 = vmatpush.msrb.mxu1 %v619_v10  ;;  %348 = vmatpush.msrb.mxu0 %v169_v57 }
  0x44   :  { %393 = vmatpush.msrb.mxu1 %v621_v11  ;;  %352 = vmatpush.msrb.mxu0 %v175_v63 }
  0x46   :  { %395 = vmatpush.msrb.mxu1 %v633_v17  ;;  %356 = vmatpush.msrb.mxu0 %v181_v12 }
  0x48   :  { %397 = vmatpush.msrb.mxu1 %v649_v25  ;;  %360 = vmatpush.msrb.mxu0 %v187_v32 }
  0x4a   :  { %399 = vmatpush.msrb.mxu1 %v653_v28  ;;  %364 = vmatpush.msrb.mxu0 %v193_v38 }
  0x4c   :  { %401 = vmatpush.msrb.mxu1 %v672_v35  ;;  %368 = vmatpush.msrb.mxu0 %v199_v50 }
  0x4e   :  { %403 = vmatpush.msrb.mxu1 %v689_v45  ;;  %372 = vmatpush.msrb.mxu0 %v205_v59 }
  0x50   :  { %405 = vmatpush.msrb.mxu1 %v701_v51  ;;  %376 = vmatpush.msrb.mxu0 %v211_v6 }
  0x51   :  { %378 = vmatmul.f32.vlgmr.msrb.gmra.mxu0 %v758_v37 }
  0x52   :  { %407 = vmatpush.msrb.mxu1 %v709_v54 }
  0x54   :  { %409 = vmatpush.msrb.mxu1 %v727_v0 }
  0x56   :  { %411 = vmatpush.msrb.mxu1 %v742_v13 }
  0x58   :  { %413 = vmatpush.msrb.mxu1 %v746_v30 }
  0x59   :  { %415 = vmatmul.f32.vlgmr.msrb.gmra.mxu1 %v758_v37 }
  0xb2   :  { %v116_v4 = vpop.f32.mrf.mxu0 }
  0xb6   :  { %v217_v3 = vpop.f32.mrf.mxu1  ;;  %v310_v11 = vpop.f32.mrf.mxu3 }
  0xb7   :  { %v218_v5 = vadd.f32 %v217_v3, %v116_v4 }
  0xb8   :  { %v271_v9 = vpop.f32.mrf.mxu2 }
  0xb9   :  { %v272_v10 = vadd.f32 %v271_v9, %v218_v5 }
  0xbb   :  { %v311_v14 = vadd.f32 %v310_v11, %v272_v10 }
  0xce   :  { %v379_v15 = vpop.f32.mrf.mxu0 }
  0xcf   :  { %v380_v16 = vadd.f32 %v379_v15, %v311_v14 }
  0xd6   :  { %v416_v17 = vpop.f32.mrf.mxu1 }
  0xd7   :  { %v417_v19 = vadd.f32 %v416_v17, %v380_v16 }
  0xd9   :  { %v419_v20 = vmul.f32 0.03125, %v417_v19 }
  0xdb   :  { %v420_v21 = vadd.f32 1e-06, %v419_v20 }
  0xdd   :  { %467 = vrsqrt.f32 %v420_v21  ;;  %vm427_vm1 = vweird.f32 %v420_v21 }
  0xe3   :  { %v468_v22 = vpop.eup %467 }
  0xe4   :  { %v422_v23 = vmul.f32 %v468_v22, %v420_v21  ;;  %vm428_vm0 = vweird.f32 %v468_v22 }
  0xe5   :  { %vm429_vm2 = vmor %vm427_vm1, %vm428_vm0 }
  0xe6   :  { %v423_v24 = vmul.f32 %v468_v22, %v422_v23 }
  0xe8   :  { %v424_v25 = vmul.f32 0.5, %v423_v24 }
  0xea   :  { %v425_v27 = vsub.f32 1.5, %v424_v25 }
  0xec   :  { %v426_v28 = vmul.f32 %v468_v22, %v425_v27 }
  0xee   :  { %v430_v33 = vsel %vm429_vm2, %v468_v22, %v426_v28 }
  0xef   :  { %v431_v34 = vmul.f32 %v430_v33, %v723_v61 }
  0xf1   :  { %v436_v35 = vmul.f32 %v466_v29, %v431_v34 }
  0xf3   :  { %437 = vst [vmem:[#allocation8] sm:$0xff] %v436_v35 }
  0xf4   :  { %441 = vsyncadd [#allocation4], 64  ;;  %s444_s30 = sshll.u32 %s863_s3, 4  ;;  %s578_s4 = smov [#allocation8]   ;;  %s445_s30 = int_to_ptr.hbm [resolvable:$true] %s444_s30 }
  0xf5   :  { %s442_s5 = sshll.u32 %s578_s4, 4  ;;  %s443_s5 = int_to_ptr.vmem [resolvable:$true] %s442_s5 }
  0xf6   :  { %450 = dma.vmem_to_hbm [thread:$0]  %s443_s5, 64, %s445_s30, [#allocation4], %s573_s22, %s573_s22, %s574_s23  }
  0xf7   :  { %569 = dma.done.wait [#allocation4], 128  }
  0xf8   :  { %570 = vsyncadd [#allocation4], 4294967168 }
  0xf9   :  { %455 = vsyncpa [#allocation3], 1 }
  0xfa   :  { %456 = vsyncpa [#allocation6], 1 }
  0xfb   :  { %457 = vsyncpa [#allocation4], 1 }

</bundles_post_ra>
